<compile_context>
chip_gen: v7x
topology: tpu7x:2x2x1
jax: 0.10.0
libtpu: 0.0.40
codegen_flags: <defaults>
</compile_context>

<pallas_src>
import math

import jax
import jax.numpy as jnp
from jax.experimental import pallas as pl
from jax.experimental.pallas import tpu as pltpu


def _round_up(x, m):
    return ((x + m - 1) // m) * m


def _cdiv(a, b):
    return -(-a // b)


def _maybe_pad(x, target_shape):
    pads = tuple((0, t - s) for s, t in zip(x.shape, target_shape))
    if all(p == (0, 0) for p in pads):
        return x  # skip the extra HBM pass when already aligned
    return jnp.pad(x, pads)


# ---------------------------------------------------------------------------
# Kernels
# ---------------------------------------------------------------------------

def _linear_kernel(x_ref, w_ref, b_ref, o_ref):
    """Resident-K linear: o = x @ w + b. No scratch, single lane-dense store."""
    y = jnp.dot(x_ref[...], w_ref[...], preferred_element_type=jnp.float32)
    o_ref[...] = (y + b_ref[...].astype(jnp.float32)).astype(o_ref.dtype)


def _linear_kernel_ktiled(x_ref, w_ref, b_ref, o_ref, acc_ref):
    """Fallback for very large feature_dim: K tiled on the last grid axis."""
    k = pl.program_id(2)

    @pl.when(k == 0)
    def _():
        acc_ref[...] = jnp.zeros_like(acc_ref)

    acc_ref[...] += jnp.dot(x_ref[...], w_ref[...],
                            preferred_element_type=jnp.float32)

    @pl.when(k == pl.num_programs(2) - 1)
    def _():
        o_ref[...] = (acc_ref[...] + b_ref[...].astype(jnp.float32)
                      ).astype(o_ref.dtype)


# ---------------------------------------------------------------------------
# Wrapper
# ---------------------------------------------------------------------------

def mixture_softmax_forward(word_attention_vectors, features, weight, bias, *,
                            tm=None, tn=None, tk=2048,
                            stream_dtype=None,
                            allow_xla_bypass=True,
                            vmem_budget_bytes=24 * 1024 * 1024):
    """Pallas implementation of MixtureSoftmax.forward.

    word_attention_vectors is accepted (signature fidelity with the PyTorch
    module) but unused, exactly as in the reference (word_gru_hidden == 0).
    """
    del word_attention_vectors  # unused by the reference forward

    batch, feature_dim = features.shape
    n_classes = weight.shape[0]
    out_dtype = features.dtype

    # Tiny-shape bypass: at the module's real sizes the pad/launch fixed costs
    # dwarf the work; plain XLA is strictly faster.
    if allow_xla_bypass and (batch * feature_dim * n_classes) < (1 << 18):
        return (features @ weight.T + bias).astype(out_dtype)

    compute_dtype = (jnp.dtype(stream_dtype) if stream_dtype is not None
                     else jnp.dtype(features.dtype))
    c_isz = compute_dtype.itemsize
    o_isz = jnp.dtype(out_dtype).itemsize
    sublane = max(8, 32 // c_isz)          # 8 f32, 16 bf16, 32 int8

    # ---- Class (N) tiling: lane-dense (multiple-of-128) blocks; only tile
    # when n_classes is large enough to threaten VMEM.
    c_pad0 = _round_up(n_classes, 128)
    desired_tn = _round_up(tn, 128) if tn is not None else 512
    if c_pad0 <= desired_tn:
        tn_eff, c_tiles = c_pad0, 1
    else:
        c_tiles = _cdiv(c_pad0, desired_tn)
        tn_eff = _round_up(_cdiv(c_pad0, c_tiles), 128)
    c_pad = tn_eff * c_tiles

    # ---- VMEM working-set models (double-buffered in/out blocks).
    def ws_resident(tm_):
        return ((2 * tm_ * feature_dim + 2 * feature_dim * tn_eff) * c_isz
                + 2 * tm_ * tn_eff * o_isz)

    def ws_ktiled(tm_, tk_):
        return ((2 * tm_ * tk_ + 2 * tk_ * tn_eff) * c_isz
                + 2 * tm_ * tn_eff * o_isz
                + tm_ * tn_eff * 4)            # f32 accumulator scratch

    desired_tm = _round_up(tm, sublane) if tm is not None else 512
    use_resident_k = ws_resident(sublane) <= vmem_budget_bytes

    if use_resident_k:
        tm_target = desired_tm
        while tm_target > sublane and ws_resident(tm_target) > vmem_budget_bytes:
            tm_target = max(sublane, _round_up(tm_target // 2, sublane))
        tk_eff, k_tiles, k_pad = feature_dim, 1, feature_dim  # no K pad needed
    else:
        tk_target = min(_round_up(tk, 128), _round_up(feature_dim, 128))
        while tk_target > 128 and ws_ktiled(sublane, tk_target) > vmem_budget_bytes:
            tk_target = max(128, _round_up(tk_target // 2, 128))
        k_tiles = _cdiv(feature_dim, tk_target)
        tk_eff = _round_up(_cdiv(feature_dim, k_tiles), 128)
        k_pad = tk_eff * k_tiles
        tm_target = desired_tm
        while tm_target > sublane and ws_ktiled(tm_target, tk_eff) > vmem_budget_bytes:
            tm_target = max(sublane, _round_up(tm_target // 2, sublane))

    # ---- M tiling: bound over-padding, and keep >= 2 M tiles whenever the
    # batch allows so both v7x TensorCores get work on the "parallel" M axis
    # (negligible cost on single-TC v5e/v6e).
    m_pad_min = _round_up(batch, sublane)
    m_tiles = _cdiv(m_pad_min, tm_target)
    if m_tiles == 1 and m_pad_min > sublane:
        m_tiles = 2
    tm_eff = _round_up(_cdiv(m_pad_min, m_tiles), sublane)
    m_pad = tm_eff * m_tiles

    # ---- Operand prep: pre-transposed MXU-ready weight, minimal padding.
    x_c = features.astype(compute_dtype)
    w_t = jnp.transpose(weight).astype(compute_dtype)      # (F, C)
    b_r = bias.reshape(1, n_classes)

    x_p = _maybe_pad(x_c, (m_pad, k_pad))
    w_p = _maybe_pad(w_t, (k_pad, c_pad))
    b_p = _maybe_pad(b_r, (1, c_pad))

    ws = ws_resident(tm_eff) if use_resident_k else ws_ktiled(tm_eff, tk_eff)
    vmem_limit = int(min(max(2 * ws, 32 * 1024 * 1024), 48 * 1024 * 1024))

    cost = pl.CostEstimate(
        flops=2 * m_pad * k_pad * c_pad,
        transcendentals=0,
        bytes_accessed=(m_pad * k_pad * c_isz
                        + k_pad * c_pad * c_isz
                        + m_pad * c_pad * o_isz),
    )

    if use_resident_k:
        # Grid order (M outer, C inner): x is streamed exactly once; with a
        # constant block index (c_tiles == 1, the common case) W is DMA'd once.
        out_padded = pl.pallas_call(
            _linear_kernel,
            out_shape=jax.ShapeDtypeStruct((m_pad, c_pad), out_dtype),
            grid=(m_tiles, c_tiles),
            in_specs=[
                pl.BlockSpec((tm_eff, k_pad), lambda i, j: (i, 0)),   # x tile
                pl.BlockSpec((k_pad, tn_eff), lambda i, j: (0, j)),   # W (K,C)
                pl.BlockSpec((1, tn_eff), lambda i, j: (0, j)),       # bias
            ],
            out_specs=pl.BlockSpec((tm_eff, tn_eff), lambda i, j: (i, j)),
            compiler_params=pltpu.CompilerParams(
                dimension_semantics=("parallel", "parallel"),
                vmem_limit_bytes=vmem_limit,
            ),
            cost_estimate=cost,
        )(x_p, w_p, b_p)
    else:
        out_padded = pl.pallas_call(
            _linear_kernel_ktiled,
            out_shape=jax.ShapeDtypeStruct((m_pad, c_pad), out_dtype),
            grid=(m_tiles, c_tiles, k_tiles),
            in_specs=[
                pl.BlockSpec((tm_eff, tk_eff), lambda i, j, k: (i, k)),
                pl.BlockSpec((tk_eff, tn_eff), lambda i, j, k: (k, j)),
                pl.BlockSpec((1, tn_eff), lambda i, j, k: (0, j)),
            ],
            out_specs=pl.BlockSpec((tm_eff, tn_eff), lambda i, j, k: (i, j)),
            scratch_shapes=[pltpu.VMEM((tm_eff, tn_eff), jnp.float32)],
            compiler_params=pltpu.CompilerParams(
                dimension_semantics=("parallel", "parallel", "arbitrary"),
                vmem_limit_bytes=vmem_limit,
            ),
            cost_estimate=cost,
        )(x_p, w_p, b_p)

    return out_padded[:batch, :n_classes]


def init_params(key, feature_dim, n_classes, dtype=jnp.float32):
    # Matches nn.Linear's uniform(-1/sqrt(fan_in), 1/sqrt(fan_in)) init.
    kw, kb = jax.random.split(key)
    bound = 1.0 / math.sqrt(feature_dim)
    weight = jax.random.uniform(
        kw, (n_classes, feature_dim), dtype=dtype, minval=-bound, maxval=bound)
    bias = jax.random.uniform(
        kb, (n_classes,), dtype=dtype, minval=-bound, maxval=bound)
    return weight, bias


if __name__ == "__main__":
    key = jax.random.PRNGKey(0)
    k_feat, k_attn, k_param, k_feat2, k_param2 = jax.random.split(key, 5)

    # ---- Module-sized example (batch=2, feature_dim=32, n_classes=4) ----
    batch_size = 2
    word_gru_hidden = 8      # ignored: the module forces it to 0 in __init__
    feature_dim = 32
    n_classes = 4

    features = jax.random.normal(k_feat, (batch_size, feature_dim), jnp.float32)
    word_attention_vectors = jax.random.normal(
        k_attn, (batch_size, 2 * word_gru_hidden), jnp.float32)  # unused
    weight, bias = init_params(k_param, feature_dim, n_classes)

    # Force the Pallas kernel (bypass disabled) so the kernel itself runs.
    out = mixture_softmax_forward(word_attention_vectors, features, weight,
                                  bias, allow_xla_bypass=False)
    out = jax.block_until_ready(out)
    ref = features @ weight.T + bias
    assert out.shape == (batch_size, n_classes)
    assert jnp.allclose(out, ref, atol=1e-5, rtol=1e-5)

    # ---- Larger shape: exercises the multi-M-tile resident-K path ----
    b2, f2, c2 = 300, 1024, 10
    feats2 = jax.random.normal(k_feat2, (b2, f2), jnp.float32)
    w2, bias2 = init_params(k_param2, f2, c2)
    out2 = jax.block_until_ready(mixture_softmax_forward(None, feats2, w2, bias2))
    ref2 = feats2 @ w2.T + bias2
    assert jnp.allclose(out2, ref2, atol=5e-4, rtol=5e-4)

    # ---- Same shape with a tiny VMEM budget: exercises the K-tiled fallback ----
    out3 = jax.block_until_ready(
        mixture_softmax_forward(None, feats2, w2, bias2,
                                vmem_budget_bytes=1 * 1024 * 1024))
    assert jnp.allclose(out3, ref2, atol=5e-4, rtol=5e-4)

    print("KERNEL_OK")
</pallas_src>

<mosaic_0001>
module attributes {stable_mosaic.version = 11 : i64} {
  func.func @_linear_kernel(%arg0: i32, %arg1: i32, %arg2: memref<8x32xf32, #tpu.memory_space<vmem>>, %arg3: memref<32x128xf32, #tpu.memory_space<vmem>>, %arg4: memref<1x128xf32, #tpu.memory_space<vmem>>, %arg5: memref<8x128xf32, #tpu.memory_space<vmem>>) attributes {dimension_semantics = [#tpu.dimension_semantics<parallel>, #tpu.dimension_semantics<parallel>], iteration_bounds = array<i64: 1, 1>, scalar_prefetch = 0 : i64, scratch_operands = 0 : i64, tpu.core_type = #tpu.core_type<tc>, window_params = [{transform_indices = @transform_0, window_bounds = array<i64: 8, 32>}, {transform_indices = @transform_1, window_bounds = array<i64: 32, 128>}, {transform_indices = @transform_2, window_bounds = array<i64: 1, 128>}, {transform_indices = @transform_3, window_bounds = array<i64: 8, 128>}]} {
    %c0 = arith.constant 0 : index
    %c0_0 = arith.constant 0 : index
    %0 = vector.load %arg2[%c0, %c0_0] : memref<8x32xf32, #tpu.memory_space<vmem>>, vector<8x32xf32>
    %c0_1 = arith.constant 0 : index
    %c0_2 = arith.constant 0 : index
    %1 = vector.load %arg3[%c0_1, %c0_2] : memref<32x128xf32, #tpu.memory_space<vmem>>, vector<32x128xf32>
    %cst = arith.constant dense<0.000000e+00> : vector<8x128xf32>
    %2 = tpu.matmul %0, %1, %cst {dimension_numbers = #tpu.dot_dimension_numbers<[1], [0], [0], [1], [0, 0, 1, 1], [], []>} : vector<8x32xf32>, vector<32x128xf32>, vector<8x128xf32> -> vector<8x128xf32>
    %c0_3 = arith.constant 0 : index
    %c0_4 = arith.constant 0 : index
    %3 = vector.load %arg4[%c0_3, %c0_4] : memref<1x128xf32, #tpu.memory_space<vmem>>, vector<1x128xf32>
    %4 = vector.broadcast %3 : vector<1x128xf32> to vector<8x128xf32>
    %5 = arith.addf %2, %4 : vector<8x128xf32>
    %c0_5 = arith.constant 0 : index
    %c0_6 = arith.constant 0 : index
    %6 = vector.load %arg5[%c0_5, %c0_6] : memref<8x128xf32, #tpu.memory_space<vmem>>, vector<8x128xf32>
    tpu.vector_store %arg5[%c0_5, %c0_6], %5 {strides = array<i32>} : memref<8x128xf32, #tpu.memory_space<vmem>>, vector<8x128xf32>,
    return
  }
  func.func @transform_0(%arg0: i32, %arg1: i32) -> (i32, i32) {
    %c0_i32 = arith.constant 0 : i32
    %c0_i32_0 = arith.constant 0 : i32
    return %arg0, %c0_i32 : i32, i32
  }
  func.func @transform_1(%arg0: i32, %arg1: i32) -> (i32, i32) {
    %c0_i32 = arith.constant 0 : i32
    %c0_i32_0 = arith.constant 0 : i32
    return %c0_i32, %arg1 : i32, i32
  }
  func.func @transform_2(%arg0: i32, %arg1: i32) -> (i32, i32) {
    %c0_i32 = arith.constant 0 : i32
    %c0_i32_0 = arith.constant 0 : i32
    return %c0_i32, %arg1 : i32, i32
  }
  func.func @transform_3(%arg0: i32, %arg1: i32) -> (i32, i32) {
    %c0_i32 = arith.constant 0 : i32
    return %arg0, %arg1 : i32, i32
  }
}

</mosaic_0001>

<bundles_post_ra>
// kernel: tpu_custom_call.1
= control target key start
LH: loop header
LB: loop body
LE: loop exit
PB: predicated region body
PF: predicated region fallthrough
CT: control target
= control target key end

     0   :  { %8 = vsyncpa [#allocation3], 0  ;;  %s322_s0 = inlined_call_operand.hbm [shape: f32[8,32], index: 0, kind: input, shape index: {}]   ;;  %s323_s1 = inlined_call_operand.hbm [shape: f32[32,128], index: 1, kind: input, shape index: {}]   ;;  %s324_s2 = inlined_call_operand.vmem [shape: f32[1,128], index: 2, kind: input, shape index: {}]   ;;  %s325_s3 = inlined_call_operand.hbm [shape: f32[8,128], index: 3, kind: output, shape index: {}]  }
   0x1   :  { %9 = vsyncpa [#allocation6], 0 }
   0x2   :  { %10 = vsyncpa [#allocation4], 0  ;;  %s248_s12 = smov [#allocation2]   ;;  %s249_s14 = smov [#allocation5]  }
   0x3   :  { %s17_s13 = sshll.u32 %s248_s12, 4  ;;  %s26_s15 = sshll.u32 %s249_s14, 4  ;;  %s18_s13 = int_to_ptr.vmem [resolvable:$true] %s17_s13  ;;  %s276_s15 = int_to_ptr.vmem [resolvable:$true] %s26_s15 }
   0x4   :  { %s176_s18 = scalar_lea.hbm %s322_s0, 128 }
   0x5   :  { %p177_p0 = scmp.ne.s32.totalorder %s322_s0, %s176_s18  ;;  %p180_p1 = scmp.lt.u32.totalorder %s176_s18, %s322_s0 }
   0x7   :  { %p182_p2 = pnand %p180_p1, %p177_p0 }
   0x9   :  { %185 = shalt.err (!%p182_p2)
}
   0xa   :  { %s186_s23 = scalar_lea.vmem %s18_s13, 128  ;;  %p191_p4 = scmp.lt.s32.totalorder %s18_s13, %s18_s13 }
   0xb   :  { %p187_p3 = scmp.ne.s32.totalorder %s18_s13, %s186_s23  ;;  %p192_p5 = scmp.lt.s32.totalorder %s186_s23, %s186_s23 }
   0xd   :  { %p193_p6 = por %p192_p5, %p191_p4 }
   0xf   :  { %p194_p7 = pnand %p193_p6, %p187_p3 }
  0x11   :  { %197 = shalt.err (!%p194_p7)
}
  0x12   :  { %20 = dma.hbm_to_vmem [thread:$0]  %s322_s0, 128, %s18_s13, [#allocation3]  }
  0x13   :  { %s198_s28 = scalar_lea.hbm %s323_s1, 512 }
  0x14   :  { %p199_p8 = scmp.ne.s32.totalorder %s323_s1, %s198_s28  ;;  %p202_p9 = scmp.lt.u32.totalorder %s198_s28, %s323_s1 }
  0x16   :  { %p204_p10 = pnand %p202_p9, %p199_p8 }
  0x18   :  { %207 = shalt.err (!%p204_p10)
}
  0x19   :  { %s208_s6 = scalar_lea.vmem %s276_s15, 512  ;;  %p213_p12 = scmp.lt.s32.totalorder %s276_s15, %s276_s15 }
  0x1a   :  { %p209_p11 = scmp.ne.s32.totalorder %s276_s15, %s208_s6  ;;  %p214_p13 = scmp.lt.s32.totalorder %s208_s6, %s208_s6 }
  0x1c   :  { %p215_p0 = por %p214_p13, %p213_p12 }
  0x1e   :  { %p216_p1 = pnand %p215_p0, %p209_p11 }
  0x20   :  { %219 = shalt.err (!%p216_p1)
}
  0x21   :  { %s250_s0 = smov 128   ;;  %s251_s7 = smov 8  }
  0x22   :  { %32 = dma.hbm_to_vmem [thread:$0]  %s323_s1, 512, %s276_s15, [#allocation6], %s250_s0, %s250_s0, %s251_s7  }
  0x23   :  { %242 = dma.done.wait [#allocation3], 128  }
  0x24   :  { %243 = vsyncadd [#allocation3], 4294967168 }
  0x25   :  { %244 = dma.done.wait [#allocation6], 512  }
  0x26   :  { %245 = vsyncadd [#allocation6], 4294966784  ;;  %v252_v0 = vmov 0.0|0.0   ;;  %vm253_vm0 = vmmov 0   ;;  %v254_v1 = vmov 0.0   ;;  %v42_v2 = vld [vmem:[#allocation5] sm:$0xff] }
  0x27   :  { %162 = vmatprep.subr.bf16.mxu0 %v252_v0  ;;  %159 = vmatprep.mubr.msk.f32.mxu0 %vm253_vm0, %v254_v1  ;;  %v43_v3 = vld [vmem:[#allocation5 + $0x8] sm:$0xff]  ;;  %v44_v4 = vld [vmem:[#allocation5 + $0x10] sm:$0xff]  ;;  %v45_v6 = vld [vmem:[#allocation5 + $0x18] sm:$0xff]  ;;  %vm53_vm1 = vcmask 261120   ;;  %s255_s11 = smov [#allocation7]  }
  0x28   :  { %v163_v5 = vpack.c.bf16 %v43_v3, %v42_v2  ;;  %v166_v7 = vpack.c.bf16 %v45_v6, %v44_v4  ;;  %v41_v8 = vld [vmem:[#allocation2] sm:$0xff]  ;;  %s134_s12 = sshll.u32 %s255_s11, 4  ;;  %s135_s12 = int_to_ptr.vmem [resolvable:$true] %s134_s12 }
  0x29   :  { %v144_v9 = vld [vmem:[%s324_s2] ss:$0 sm:$0xff]  ;;  %s220_s13 = scalar_lea.vmem %s135_s12, 128  ;;  %p225_p3 = scmp.lt.s32.totalorder %s135_s12, %s135_s12 }
  0x2a   :  { %164 = vmatpush3.bf16.msra.mxu0 %v163_v5  ;;  %p221_p2 = scmp.ne.s32.totalorder %s135_s12, %s220_s13  ;;  %p226_p4 = scmp.lt.s32.totalorder %s220_s13, %s220_s13 }
  0x2b   :  { %165 = vmatprep.subr.bf16.mxu0 %v252_v0 }
  0x2c   :  { %p227_p5 = por %p226_p4, %p225_p3 }
  0x2e   :  { %167 = vmatpush3.bf16.msra.mxu0 %v166_v7  ;;  %p228_p6 = pnand %p227_p5, %p221_p2 }
  0x31   :  { %160 = vmatmul.mubr.msk.f32.vlgmr.msra.gmra.mrb[0].mxu0 %vm53_vm1, %v41_v8 }
 0x104   :  { %v123_v10 = vpop.f32.mrb[0].mxu0 }
 0x105   :  { %v124_v11 = vadd.f32 %v144_v9, %v123_v10  ;;  %v161_v12 = vpop.f32.mrb[1].mxu0 }
 0x107   :  { %127 = vst [vmem:[#allocation7] sm:$0xff] %v124_v11 }
 0x108   :  { %231 = shalt.err (!%p228_p6)
}
 0x109   :  { %s232_s16 = scalar_lea.hbm %s325_s3, 128 }
 0x10a   :  { %p233_p7 = scmp.ne.s32.totalorder %s325_s3, %s232_s16  ;;  %p236_p8 = scmp.lt.u32.totalorder %s232_s16, %s325_s3 }
 0x10c   :  { %p238_p9 = pnand %p236_p8, %p233_p7 }
 0x10e   :  { %241 = shalt.err (!%p238_p9)
}
 0x10f   :  { %137 = dma.vmem_to_hbm [thread:$0]  %s135_s12, 128, %s325_s3, [#allocation4]  }
 0x110   :  { %246 = dma.done.wait [#allocation4], 128  }
 0x111   :  { %247 = vsyncadd [#allocation4], 4294967168 }
 0x112   :  { %141 = vsyncpa [#allocation3], 1 }
 0x113   :  { %142 = vsyncpa [#allocation6], 1 }
 0x114   :  { %143 = vsyncpa [#allocation4], 1 }

</bundles_post_ra>
